<compile_context>
chip_gen: v5e
topology: v5e:2x2
jax: 0.10.0
libtpu: 0.0.40
codegen_flags: <defaults>
</compile_context>

<pallas_src>
import jax
import jax.numpy as jnp
from jax.experimental import pallas as pl
from jax.experimental.pallas import tpu as pltpu

D_IN, D_H, D_OUT = 10, 100, 10
K1 = 16    # first-layer contraction pad (>= D_IN, multiple of 8)
NH = 128   # hidden width pad (lane-dense for the two big matmuls)
NO = 16    # output width pad (>= D_OUT, multiple of 8)


# ----------------------------------------------------------------------------- kernel
def mlp_kernel(x_ref, w1_ref, b1_ref, w2_ref, b2_ref, w3_ref, b3_ref, o_ref):
    h = jnp.dot(x_ref[...], w1_ref[...], preferred_element_type=jnp.float32)
    h = jnp.maximum(h + b1_ref[...], 0.0)
    h = jnp.dot(h, w2_ref[...], preferred_element_type=jnp.float32)
    h = jnp.maximum(h + b2_ref[...], 0.0)
    o = jnp.dot(h, w3_ref[...], preferred_element_type=jnp.float32)
    o_ref[...] = o + b3_ref[...]


# ----------------------------------------------------------------------------- packing
def _round_up(a, m):
    return ((a + m - 1) // m) * m


def _pad2(a, rows, cols):
    r, c = a.shape
    return jnp.pad(a, ((0, rows - r), (0, cols - c)))


def pack_params(params):
    """One-time packing of PyTorch-layout params (w: (out,in), b: (out,)).

    Transposes to (in, out) and zero-pads: w1 -> (16,128), w2 -> (128,128),
    w3 -> (128,16), biases to matching widths.  Call once at load time.
    """
    f32 = jnp.float32
    return {
        "w1": _pad2(params["w1"].T.astype(f32), K1, NH),
        "b1": _pad2(params["b1"].reshape(1, -1).astype(f32), 1, NH),
        "w2": _pad2(params["w2"].T.astype(f32), NH, NH),
        "b2": _pad2(params["b2"].reshape(1, -1).astype(f32), 1, NH),
        "w3": _pad2(params["w3"].T.astype(f32), NH, NO),
        "b3": _pad2(params["b3"].reshape(1, -1).astype(f32), 1, NO),
    }


# ----------------------------------------------------------------------------- wrapper
def two_hidden_layer_fc(x, packed):
    """x: (B, 10) float32, packed: output of pack_params. Returns (B, 10)."""
    B = x.shape[0]

    # Batch tiling: sublane-aligned; for B >= 16 force >= 2 grid steps so a
    # v7x chip can shard the "parallel" grid axis across its 2 TensorCores.
    B8 = _round_up(max(B, 1), 8)
    if B8 >= 16:
        tm = min(2048, _round_up(pl.cdiv(B8, 2), 8))
    else:
        tm = B8
    Bp = _round_up(B, tm)

    # Only cheap pads remain in the per-call path: rows to Bp, lanes 10 -> 16.
    xp = jnp.pad(x.astype(jnp.float32), ((0, Bp - B), (0, K1 - D_IN)))

    row_in = pl.BlockSpec((tm, K1), lambda i: (i, 0))
    row_out = pl.BlockSpec((tm, NO), lambda i: (i, 0))
    w1_spec = pl.BlockSpec((K1, NH), lambda i: (0, 0))
    w2_spec = pl.BlockSpec((NH, NH), lambda i: (0, 0))
    w3_spec = pl.BlockSpec((NH, NO), lambda i: (0, 0))
    b1_spec = pl.BlockSpec((1, NH), lambda i: (0, 0))
    b2_spec = pl.BlockSpec((1, NH), lambda i: (0, 0))
    b3_spec = pl.BlockSpec((1, NO), lambda i: (0, 0))

    out = pl.pallas_call(
        mlp_kernel,
        out_shape=jax.ShapeDtypeStruct((Bp, NO), jnp.float32),
        grid=(Bp // tm,),
        in_specs=[row_in, w1_spec, b1_spec, w2_spec, b2_spec, w3_spec, b3_spec],
        out_specs=row_out,
        compiler_params=pltpu.CompilerParams(
            dimension_semantics=("parallel",)),
    )(xp, packed["w1"], packed["b1"], packed["w2"], packed["b2"],
      packed["w3"], packed["b3"])

    # Padded batch rows / output lanes are sliced off (padded rows are NOT zero).
    return out[:B, :D_OUT]


# ----------------------------------------------------------------------------- reference
def reference(x, p):
    h = jax.nn.relu(x @ p["w1"].T + p["b1"])
    h = jax.nn.relu(h @ p["w2"].T + p["b2"])
    return h @ p["w3"].T + p["b3"]


# ----------------------------------------------------------------------------- main
if __name__ == "__main__":
    B = 8

    key = jax.random.PRNGKey(0)
    ks = jax.random.split(key, 7)
    x = jax.random.normal(ks[0], (B, D_IN), jnp.float32)
    params = {
        "w1": 0.1 * jax.random.normal(ks[1], (D_H, D_IN), jnp.float32),
        "b1": 0.1 * jax.random.normal(ks[2], (D_H,), jnp.float32),
        "w2": 0.1 * jax.random.normal(ks[3], (D_H, D_H), jnp.float32),
        "b2": 0.1 * jax.random.normal(ks[4], (D_H,), jnp.float32),
        "w3": 0.1 * jax.random.normal(ks[5], (D_OUT, D_H), jnp.float32),
        "b3": 0.1 * jax.random.normal(ks[6], (D_OUT,), jnp.float32),
    }

    packed = pack_params(params)          # one-time, outside the call path
    fwd = jax.jit(two_hidden_layer_fc)

    out = jax.block_until_ready(fwd(x, packed))

    ref = reference(x, params)
    assert out.shape == ref.shape, (out.shape, ref.shape)
    assert bool(jnp.allclose(out, ref, atol=1e-3, rtol=1e-3)), (
        "max abs err = %g" % float(jnp.max(jnp.abs(out - ref))))

    print("KERNEL_OK")
</pallas_src>

<mosaic_0001>
module attributes {stable_mosaic.version = 11 : i64} {
  func.func @mlp_kernel(%arg0: i32, %arg1: memref<8x16xf32, #tpu.memory_space<vmem>>, %arg2: memref<16x128xf32, #tpu.memory_space<vmem>>, %arg3: memref<1x128xf32, #tpu.memory_space<vmem>>, %arg4: memref<128x128xf32, #tpu.memory_space<vmem>>, %arg5: memref<1x128xf32, #tpu.memory_space<vmem>>, %arg6: memref<128x16xf32, #tpu.memory_space<vmem>>, %arg7: memref<1x16xf32, #tpu.memory_space<vmem>>, %arg8: memref<8x16xf32, #tpu.memory_space<vmem>>) attributes {dimension_semantics = [#tpu.dimension_semantics<parallel>], iteration_bounds = array<i64: 1>, scalar_prefetch = 0 : i64, scratch_operands = 0 : i64, tpu.core_type = #tpu.core_type<tc>, window_params = [{transform_indices = @transform_0, window_bounds = array<i64: 8, 16>}, {pipeline_mode = #tpu.pipeline_mode<synchronous>, transform_indices = @transform_1, window_bounds = array<i64: 16, 128>}, {pipeline_mode = #tpu.pipeline_mode<synchronous>, transform_indices = @transform_2, window_bounds = array<i64: 1, 128>}, {pipeline_mode = #tpu.pipeline_mode<synchronous>, transform_indices = @transform_3, window_bounds = array<i64: 128, 128>}, {pipeline_mode = #tpu.pipeline_mode<synchronous>, transform_indices = @transform_4, window_bounds = array<i64: 1, 128>}, {pipeline_mode = #tpu.pipeline_mode<synchronous>, transform_indices = @transform_5, window_bounds = array<i64: 128, 16>}, {pipeline_mode = #tpu.pipeline_mode<synchronous>, transform_indices = @transform_6, window_bounds = array<i64: 1, 16>}, {transform_indices = @transform_7, window_bounds = array<i64: 8, 16>}]} {
    %c0 = arith.constant 0 : index
    %c0_0 = arith.constant 0 : index
    %0 = vector.load %arg1[%c0, %c0_0] : memref<8x16xf32, #tpu.memory_space<vmem>>, vector<8x16xf32>
    %c0_1 = arith.constant 0 : index
    %c0_2 = arith.constant 0 : index
    %1 = vector.load %arg2[%c0_1, %c0_2] : memref<16x128xf32, #tpu.memory_space<vmem>>, vector<16x128xf32>
    %cst = arith.constant dense<0.000000e+00> : vector<8x128xf32>
    %2 = tpu.matmul %0, %1, %cst {dimension_numbers = #tpu.dot_dimension_numbers<[1], [0], [0], [1], [0, 0, 1, 1], [], []>} : vector<8x16xf32>, vector<16x128xf32>, vector<8x128xf32> -> vector<8x128xf32>
    %c0_3 = arith.constant 0 : index
    %c0_4 = arith.constant 0 : index
    %3 = vector.load %arg3[%c0_3, %c0_4] : memref<1x128xf32, #tpu.memory_space<vmem>>, vector<1x128xf32>
    %4 = vector.broadcast %3 : vector<1x128xf32> to vector<8x128xf32>
    %5 = arith.addf %2, %4 : vector<8x128xf32>
    %cst_5 = arith.constant 0.000000e+00 : f32
    %6 = vector.broadcast %cst_5 : f32 to vector<8x128xf32>
    %7 = arith.maximumf %5, %6 : vector<8x128xf32>
    %c0_6 = arith.constant 0 : index
    %c0_7 = arith.constant 0 : index
    %8 = vector.load %arg4[%c0_6, %c0_7] : memref<128x128xf32, #tpu.memory_space<vmem>>, vector<128x128xf32>
    %cst_8 = arith.constant dense<0.000000e+00> : vector<8x128xf32>
    %9 = tpu.matmul %7, %8, %cst_8 {dimension_numbers = #tpu.dot_dimension_numbers<[1], [0], [0], [1], [0, 0, 1, 1], [], []>} : vector<8x128xf32>, vector<128x128xf32>, vector<8x128xf32> -> vector<8x128xf32>
    %c0_9 = arith.constant 0 : index
    %c0_10 = arith.constant 0 : index
    %10 = vector.load %arg5[%c0_9, %c0_10] : memref<1x128xf32, #tpu.memory_space<vmem>>, vector<1x128xf32>
    %11 = vector.broadcast %10 : vector<1x128xf32> to vector<8x128xf32>
    %12 = arith.addf %9, %11 : vector<8x128xf32>
    %cst_11 = arith.constant 0.000000e+00 : f32
    %13 = vector.broadcast %cst_11 : f32 to vector<8x128xf32>
    %14 = arith.maximumf %12, %13 : vector<8x128xf32>
    %c0_12 = arith.constant 0 : index
    %c0_13 = arith.constant 0 : index
    %15 = vector.load %arg6[%c0_12, %c0_13] : memref<128x16xf32, #tpu.memory_space<vmem>>, vector<128x16xf32>
    %cst_14 = arith.constant dense<0.000000e+00> : vector<8x16xf32>
    %16 = tpu.matmul %14, %15, %cst_14 {dimension_numbers = #tpu.dot_dimension_numbers<[1], [0], [0], [1], [0, 0, 1, 1], [], []>} : vector<8x128xf32>, vector<128x16xf32>, vector<8x16xf32> -> vector<8x16xf32>
    %c0_15 = arith.constant 0 : index
    %c0_16 = arith.constant 0 : index
    %17 = vector.load %arg7[%c0_15, %c0_16] : memref<1x16xf32, #tpu.memory_space<vmem>>, vector<1x16xf32>
    %18 = vector.broadcast %17 : vector<1x16xf32> to vector<8x16xf32>
    %19 = arith.addf %16, %18 : vector<8x16xf32>
    %c0_17 = arith.constant 0 : index
    %c0_18 = arith.constant 0 : index
    %20 = vector.load %arg8[%c0_17, %c0_18] : memref<8x16xf32, #tpu.memory_space<vmem>>, vector<8x16xf32>
    tpu.vector_store %arg8[%c0_17, %c0_18], %19 {strides = array<i32>} : memref<8x16xf32, #tpu.memory_space<vmem>>, vector<8x16xf32>,
    return
  }
  func.func @transform_0(%arg0: i32) -> (i32, i32) {
    %c0_i32 = arith.constant 0 : i32
    %c0_i32_0 = arith.constant 0 : i32
    return %arg0, %c0_i32 : i32, i32
  }
  func.func @transform_1(%arg0: i32) -> (i32, i32) {
    %c0_i32 = arith.constant 0 : i32
    %c0_i32_0 = arith.constant 0 : i32
    %c0_i32_1 = arith.constant 0 : i32
    return %c0_i32, %c0_i32_0 : i32, i32
  }
  func.func @transform_2(%arg0: i32) -> (i32, i32) {
    %c0_i32 = arith.constant 0 : i32
    %c0_i32_0 = arith.constant 0 : i32
    %c0_i32_1 = arith.constant 0 : i32
    return %c0_i32, %c0_i32_0 : i32, i32
  }
  func.func @transform_3(%arg0: i32) -> (i32, i32) {
    %c0_i32 = arith.constant 0 : i32
    %c0_i32_0 = arith.constant 0 : i32
    %c0_i32_1 = arith.constant 0 : i32
    return %c0_i32, %c0_i32_0 : i32, i32
  }
  func.func @transform_4(%arg0: i32) -> (i32, i32) {
    %c0_i32 = arith.constant 0 : i32
    %c0_i32_0 = arith.constant 0 : i32
    %c0_i32_1 = arith.constant 0 : i32
    return %c0_i32, %c0_i32_0 : i32, i32
  }
  func.func @transform_5(%arg0: i32) -> (i32, i32) {
    %c0_i32 = arith.constant 0 : i32
    %c0_i32_0 = arith.constant 0 : i32
    %c0_i32_1 = arith.constant 0 : i32
    return %c0_i32, %c0_i32_0 : i32, i32
  }
  func.func @transform_6(%arg0: i32) -> (i32, i32) {
    %c0_i32 = arith.constant 0 : i32
    %c0_i32_0 = arith.constant 0 : i32
    %c0_i32_1 = arith.constant 0 : i32
    return %c0_i32, %c0_i32_0 : i32, i32
  }
  func.func @transform_7(%arg0: i32) -> (i32, i32) {
    %c0_i32 = arith.constant 0 : i32
    %c0_i32_0 = arith.constant 0 : i32
    return %arg0, %c0_i32 : i32, i32
  }
}

</mosaic_0001>

<bundles_post_ra>
// kernel: two_hidden_layer_fc.1
= control target key start
LH: loop header
LB: loop body
LE: loop exit
PB: predicated region body
PF: predicated region fallthrough
CT: control target
= control target key end

     0   :  { %vm34_vm0 = vcmask 130048   ;;  %s348_s0 = inlined_call_operand.vmem [shape: f32[8,16], index: 0, kind: input, shape index: {}]   ;;  %s349_s1 = inlined_call_operand.vmem [shape: f32[16,128], index: 1, kind: input, shape index: {}]   ;;  %s350_s2 = inlined_call_operand.vmem [shape: f32[1,128], index: 2, kind: input, shape index: {}]   ;;  %s351_s3 = inlined_call_operand.vmem [shape: f32[128,128], index: 3, kind: input, shape index: {}]   ;;  %s352_s4 = inlined_call_operand.vmem [shape: f32[1,128], index: 4, kind: input, shape index: {}]   ;;  %s353_s5 = inlined_call_operand.vmem [shape: f32[128,16], index: 5, kind: input, shape index: {}]   ;;  %s354_s6 = inlined_call_operand.vmem [shape: f32[1,16], index: 6, kind: input, shape index: {}]   ;;  %s355_s7 = inlined_call_operand.hbm [shape: f32[8,16], index: 7, kind: output, shape index: {}]  }
   0x1   :  { %v29_v0 = vld [vmem:[%s349_s1 + $0x8] sm:$0xff]  ;;  %v28_v1 = vld [vmem:[%s349_s1] sm:$0xff]  ;;  %v74_v3 = vld [vmem:[%s351_s3 + $0x78] sm:$0xff] }
   0x2   :  { %52 = vmatpush.msra.mxu0 %v29_v0  ;;  %v27_v2 = vld [vmem:[%s348_s0] sm:$0xff]  ;;  %v73_v4 = vld [vmem:[%s351_s3 + $0x70] sm:$0xff]  ;;  %79 = vmatpush.msra.mxu1 %v74_v3  ;;  %v72_v5 = vld [vmem:[%s351_s3 + $0x68] sm:$0xff] }
   0x3   :  { %v71_v6 = vld [vmem:[%s351_s3 + $0x60] sm:$0xff] }
   0x4   :  { %53 = vmatpush.msra.mxu0 %v28_v1  ;;  %80 = vmatpush.msra.mxu1 %v73_v4 }
   0x5   :  { %157 = vmatmul.msk.f32.vlgmr.msra.gmra.mxu0 %vm34_vm0, %v27_v2 }
   0x6   :  { %81 = vmatpush.msra.mxu1 %v72_v5 }
   0x7   :  { %12 = vsyncpa [#allocation3], 0  ;;  %v70_v7 = vld [vmem:[%s351_s3 + $0x58] sm:$0xff]  ;;  %v69_v8 = vld [vmem:[%s351_s3 + $0x50] sm:$0xff]  ;;  %s188_s22 = smov [#allocation2]   ;;  %s148_s26 = sshll.u32 %s355_s7, 4  ;;  %s149_s26 = int_to_ptr.hbm [resolvable:$true] %s148_s26 }
   0x8   :  { %82 = vmatpush.msra.mxu1 %v71_v6  ;;  %v68_v9 = vld [vmem:[%s351_s3 + $0x48] sm:$0xff]  ;;  %v67_v10 = vld [vmem:[%s351_s3 + $0x40] sm:$0xff]  ;;  %v66_v11 = vld [vmem:[%s351_s3 + $0x38] sm:$0xff]  ;;  %s146_s23 = sshll.u32 %s188_s22, 4  ;;  %s147_s23 = int_to_ptr.vmem [resolvable:$true] %s146_s23 }
   0x9   :  { %v65_v12 = vld [vmem:[%s351_s3 + $0x30] sm:$0xff]  ;;  %v64_v13 = vld [vmem:[%s351_s3 + $0x28] sm:$0xff]  ;;  %v63_v14 = vld [vmem:[%s351_s3 + $0x20] sm:$0xff] }
   0xa   :  { %83 = vmatpush.msra.mxu1 %v70_v7  ;;  %v62_v15 = vld [vmem:[%s351_s3 + $0x18] sm:$0xff]  ;;  %v61_v16 = vld [vmem:[%s351_s3 + $0x10] sm:$0xff]  ;;  %v60_v17 = vld [vmem:[%s351_s3 + $0x8] sm:$0xff] }
   0xb   :  { %v59_v18 = vld [vmem:[%s351_s3] sm:$0xff]  ;;  %v115_v19 = vld [vmem:[%s353_s5 + $0x78] sm:$0xff]  ;;  %v114_v20 = vld [vmem:[%s353_s5 + $0x70] sm:$0xff] }
   0xc   :  { %84 = vmatpush.msra.mxu1 %v69_v8  ;;  %120 = vmatpush.msra.mxu2 %v115_v19  ;;  %v113_v21 = vld [vmem:[%s353_s5 + $0x68] sm:$0xff]  ;;  %v112_v22 = vld [vmem:[%s353_s5 + $0x60] sm:$0xff]  ;;  %v111_v23 = vld [vmem:[%s353_s5 + $0x58] sm:$0xff] }
   0xd   :  { %v110_v24 = vld [vmem:[%s353_s5 + $0x50] sm:$0xff]  ;;  %v109_v25 = vld [vmem:[%s353_s5 + $0x48] sm:$0xff]  ;;  %v108_v26 = vld [vmem:[%s353_s5 + $0x40] sm:$0xff] }
   0xe   :  { %85 = vmatpush.msra.mxu1 %v68_v9  ;;  %121 = vmatpush.msra.mxu2 %v114_v20  ;;  %v107_v27 = vld [vmem:[%s353_s5 + $0x38] sm:$0xff]  ;;  %v106_v28 = vld [vmem:[%s353_s5 + $0x30] sm:$0xff]  ;;  %v105_v29 = vld [vmem:[%s353_s5 + $0x28] sm:$0xff] }
   0xf   :  { %v104_v30 = vld [vmem:[%s353_s5 + $0x20] sm:$0xff]  ;;  %v103_v31 = vld [vmem:[%s353_s5 + $0x18] sm:$0xff]  ;;  %v102_v36 = vld [vmem:[%s353_s5 + $0x10] sm:$0xff] }
  0x10   :  { %86 = vmatpush.msra.mxu1 %v67_v10  ;;  %122 = vmatpush.msra.mxu2 %v113_v21  ;;  %v159_v32 = vld [vmem:[%s350_s2] ss:$0 sm:$0xff]  ;;  %v101_v37 = vld [vmem:[%s353_s5 + $0x8] sm:$0xff] }
  0x11   :  { %v100_v38 = vld [vmem:[%s353_s5] sm:$0xff] }
  0x12   :  { %87 = vmatpush.msra.mxu1 %v66_v11  ;;  %123 = vmatpush.msra.mxu2 %v112_v22  ;;  %v160_v39 = vld [vmem:[%s352_s4] ss:$0 sm:$0xff] }
  0x13   :  { %v161_v43 = vld [vmem:[%s354_s6] ss:$0 sm:$0xff] }
  0x14   :  { %88 = vmatpush.msra.mxu1 %v65_v12  ;;  %124 = vmatpush.msra.mxu2 %v111_v23 }
  0x16   :  { %89 = vmatpush.msra.mxu1 %v64_v13  ;;  %125 = vmatpush.msra.mxu2 %v110_v24 }
  0x18   :  { %90 = vmatpush.msra.mxu1 %v63_v14  ;;  %126 = vmatpush.msra.mxu2 %v109_v25 }
  0x1a   :  { %91 = vmatpush.msra.mxu1 %v62_v15  ;;  %127 = vmatpush.msra.mxu2 %v108_v26 }
  0x1c   :  { %92 = vmatpush.msra.mxu1 %v61_v16  ;;  %128 = vmatpush.msra.mxu2 %v107_v27 }
  0x1e   :  { %93 = vmatpush.msra.mxu1 %v60_v17  ;;  %129 = vmatpush.msra.mxu2 %v106_v28 }
  0x20   :  { %94 = vmatpush.msra.mxu1 %v59_v18  ;;  %130 = vmatpush.msra.mxu2 %v105_v29 }
  0x22   :  { %131 = vmatpush.msra.mxu2 %v104_v30 }
  0x24   :  { %132 = vmatpush.msra.mxu2 %v103_v31 }
  0x26   :  { %133 = vmatpush.msra.mxu2 %v102_v36 }
  0x28   :  { %134 = vmatpush.msra.mxu2 %v101_v37 }
  0x2a   :  { %135 = vmatpush.msra.mxu2 %v100_v38 }
  0x82   :  { %v55_v33 = vpop.f32.mrf.mxu0 }
  0x83   :  { %v56_v34 = vadd.f32 %v159_v32, %v55_v33 }
  0x85   :  { %v58_v35 = vmax.f32 %v56_v34, 0.0 }
  0x87   :  { %95 = vmatmul.f32.vlgmr.msra.gmra.mxu1 %v58_v35 }
 0x104   :  { %v96_v40 = vpop.f32.mrf.mxu1 }
 0x105   :  { %v97_v41 = vadd.f32 %v160_v39, %v96_v40 }
 0x107   :  { %v99_v42 = vmax.f32 %v97_v41, 0.0 }
 0x109   :  { %136 = vmatmul.f32.vlgmr.msra.gmra.mxu2 %v99_v42 }
 0x18c   :  { %v137_v44 = vpop.f32.mrf.mxu2 }
 0x18d   :  { %v138_v45 = vadd.f32 %v161_v43, %v137_v44 }
 0x18f   :  { %140 = vst.msk [vmem:[#allocation2] sm:$0xff] %vm34_vm0, %v138_v45 }
 0x190   :  { %151 = dma.vmem_to_hbm [thread:$0]  %s147_s23, 128, %s149_s26, [#allocation3]  }
 0x191   :  { %186 = dma.done.wait [#allocation3], 128  }
 0x192   :  { %187 = vsyncadd [#allocation3], 4294967168 }
 0x193   :  { %156 = vsyncpa [#allocation3], 1 }

</bundles_post_ra>
